<compile_context>
chip_gen: v7x
topology: tpu7x:2x2x1
jax: 0.10.0
libtpu: 0.0.40
codegen_flags: <defaults>
</compile_context>

<pallas_src>
import functools

import numpy as np
import jax
import jax.numpy as jnp
from jax.experimental import pallas as pl
from jax.experimental.pallas import tpu as pltpu

_LANE = 128                   # TPU lane width (fast axis)
_TILE_BYTES_TARGET = 4 << 20  # ~4 MiB per input tile (x2 inputs x2 buffers = 16 MiB VMEM)
_SMALL_FAST_PATH = 1 << 20    # below ~1M elements a fused XLA reduce beats a Pallas launch
_VMEM_LIMIT_BYTES = 32 << 20  # raises v5e's 16 MiB scoped default; equals v6e/v7x default

_LOSS_TYPES = ("L1", "L2", "SmoothL1")


def _elementwise_error(d, loss_type, beta):
    """Per-element loss on the (already f32) difference d."""
    if loss_type == "L1":
        return jnp.abs(d)
    if loss_type == "L2":
        return d * d
    # SmoothL1 (huber), PyTorch default beta=1.0
    ad = jnp.abs(d)
    return jnp.where(ad < beta, 0.5 * d * d / beta, ad - 0.5 * beta)


def _euler_loss_kernel(pre_ref, label_ref, out_ref, *, loss_type, beta, rows, tm, mask_rows):
    """Per-tile elementwise loss + partial reduction to a lane-dense (1,8,128) block."""
    # Native-dtype DMA; upcast to f32 for the math (keeps L2/SmoothL1 accurate).
    d = pre_ref[...].astype(jnp.float32) - label_ref[...].astype(jnp.float32)
    e = _elementwise_error(d, loss_type, beta)

    if mask_rows:
        # The last grid step's block extends past `rows`; Pallas pads it with
        # unspecified data.  Zero those rows (jnp.where also neutralizes NaN/Inf).
        valid = rows - pl.program_id(0) * tm              # >= tm for all but the last tile
        row_id = jax.lax.broadcasted_iota(jnp.int32, e.shape, 0)
        e = jnp.where(row_id < valid, e, 0.0)

    # Reduce the (tm, 128) tile to a lane-dense (8, 128) partial sum (VPU only,
    # no cross-lane work); unmasked full-vreg store.
    out_ref[...] = jnp.sum(e.reshape(tm // 8, 8, _LANE), axis=0)[None]


def _elementwise_loss_mean(pre, label, *, loss_type="L1", beta=1.0, tm=None, use_pallas=None):
    """mean(loss_elementwise(pre, label)) over ALL elements."""
    if loss_type not in _LOSS_TYPES:
        raise ValueError(f"Unknown loss type: {loss_type}")
    assert pre.shape == label.shape, "pre and label must have identical shapes"
    total = int(np.prod(pre.shape)) if pre.ndim > 0 else 1

    if use_pallas is None:
        use_pallas = total >= _SMALL_FAST_PATH

    if not use_pallas or total == 0:
        # Tiny-input fast path: the intended EulerLoss workload is (B, 3) Euler
        # angles, where a fused XLA reduce is strictly faster than a Pallas launch.
        d = pre.astype(jnp.float32) - label.astype(jnp.float32)
        return jnp.mean(_elementwise_error(d, loss_type, beta))

    itemsize = jnp.dtype(pre.dtype).itemsize
    sub = 8 * max(1, 4 // itemsize)        # sublane multiple: f32 -> 8, bf16/f16 -> 16, 8-bit -> 32
    rows = -(-total // _LANE)              # ceil(total / 128)

    if tm is None:
        # ~4 MiB per input tile in the NATIVE dtype; keep >= 2 grid steps when
        # possible so the "parallel" axis actually feeds both v7x TensorCores.
        tm_target = max(sub, _TILE_BYTES_TARGET // (_LANE * itemsize))
        tm = min(tm_target, -(-rows // 2))
    tm = max(sub, ((int(tm) + sub - 1) // sub) * sub)      # sublane-aligned tile height
    num_tiles = max(1, -(-rows // tm))
    mask_rows = (rows % tm) != 0                            # ragged last tile -> in-kernel mask

    def _as_rows(x):
        x = jnp.ravel(x)                                    # free (row-major view), native dtype
        if total != rows * _LANE:
            # Only needed when total is not a multiple of 128 so the reshape is legal.
            # TODO(synk): this still costs an O(N) copy; a tail-only kernel on the last
            # <128 elements would avoid it, but the common aligned case is zero-copy.
            x = jnp.pad(x, (0, rows * _LANE - total))       # zeros contribute 0 to the loss
        return x.reshape(rows, _LANE)                       # free: reshape of contiguous ravel

    pre2 = _as_rows(pre)
    label2 = _as_rows(label)

    kernel = functools.partial(
        _euler_loss_kernel, loss_type=loss_type, beta=beta, rows=rows, tm=tm, mask_rows=mask_rows
    )

    partials = pl.pallas_call(
        kernel,
        out_shape=jax.ShapeDtypeStruct((num_tiles, 8, _LANE), jnp.float32),
        grid=(num_tiles,),
        in_specs=[
            pl.BlockSpec((tm, _LANE), lambda i: (i, 0)),
            pl.BlockSpec((tm, _LANE), lambda i: (i, 0)),
        ],
        out_specs=pl.BlockSpec((1, 8, _LANE), lambda i: (i, 0, 0)),
        compiler_params=pltpu.CompilerParams(
            dimension_semantics=("parallel",),       # independent tiles -> megacore-friendly
            vmem_limit_bytes=_VMEM_LIMIT_BYTES,      # headroom for 4 MiB tiles on v5e
        ),
    )(pre2, label2)

    # Tiny final reduction + mean over the TRUE (unpadded) element count.
    return jnp.sum(partials) / jnp.float32(total)


def euler_loss(ori_pre_dict, ori_label_dict, *, loss_type="L1", beta=1.0, tm=None, use_pallas=None):
    """Pallas equivalent of EulerLoss(loss_type).forward(pre_dict, label_dict)."""
    val = _elementwise_loss_mean(
        ori_pre_dict["euler"], ori_label_dict["euler"],
        loss_type=loss_type, beta=beta, tm=tm, use_pallas=use_pallas,
    )
    return {"euler_loss": val}


def _reference(pre, label, loss_type="L1", beta=1.0):
    d = pre.astype(jnp.float32) - label.astype(jnp.float32)
    return jnp.mean(_elementwise_error(d, loss_type, beta))


if __name__ == "__main__":
    key = jax.random.PRNGKey(0)
    ks = jax.random.split(key, 8)

    # 1) The intended EulerLoss workload: a small batch of Euler-angle triplets.
    #    (tiny input -> fused-XLA fast path, as the perf review recommends)
    pre = jax.random.normal(ks[0], (16, 3), dtype=jnp.float32)
    label = jax.random.normal(ks[1], (16, 3), dtype=jnp.float32)
    for lt in _LOSS_TYPES:
        out = euler_loss({"euler": pre}, {"euler": label}, loss_type=lt)["euler_loss"]
        jax.block_until_ready(out)
        np.testing.assert_allclose(
            np.asarray(out), np.asarray(_reference(pre, label, lt)), rtol=1e-5, atol=1e-6)

    # 2) Force the Pallas path on a lane-aligned input (multiple grid tiles, no masking).
    pre2 = jax.random.normal(ks[2], (4, 64, 128), dtype=jnp.float32)
    label2 = jax.random.normal(ks[3], (4, 64, 128), dtype=jnp.float32)
    for lt in _LOSS_TYPES:
        out2 = _elementwise_loss_mean(pre2, label2, loss_type=lt, tm=64, use_pallas=True)
        jax.block_until_ready(out2)
        np.testing.assert_allclose(
            np.asarray(out2), np.asarray(_reference(pre2, label2, lt)), rtol=1e-4, atol=1e-6)

    # 3) Unaligned total + ragged last tile (exercises the in-kernel row mask).
    pre3 = jax.random.normal(ks[4], (37, 250), dtype=jnp.float32)
    label3 = jax.random.normal(ks[5], (37, 250), dtype=jnp.float32)
    out3 = _elementwise_loss_mean(pre3, label3, loss_type="L1", tm=16, use_pallas=True)
    jax.block_until_ready(out3)
    np.testing.assert_allclose(
        np.asarray(out3), np.asarray(_reference(pre3, label3, "L1")), rtol=1e-4, atol=1e-6)

    # 4) Native bf16 inputs (halved DMA bytes; kernel upcasts to f32 for the math).
    pre4 = jax.random.normal(ks[6], (8, 64, 128), dtype=jnp.bfloat16)
    label4 = jax.random.normal(ks[7], (8, 64, 128), dtype=jnp.bfloat16)
    out4 = _elementwise_loss_mean(pre4, label4, loss_type="SmoothL1", tm=32, use_pallas=True)
    jax.block_until_ready(out4)
    np.testing.assert_allclose(
        np.asarray(out4), np.asarray(_reference(pre4, label4, "SmoothL1")), rtol=1e-4, atol=1e-6)

    print("KERNEL_OK")
</pallas_src>

<mosaic_0001>
module attributes {stable_mosaic.version = 11 : i64} {
  func.func @_euler_loss_kernel(%arg0: i32, %arg1: memref<64x128xf32, #tpu.memory_space<vmem>>, %arg2: memref<64x128xf32, #tpu.memory_space<vmem>>, %arg3: memref<1x8x128xf32, #tpu.memory_space<vmem>>) attributes {dimension_semantics = [#tpu.dimension_semantics<parallel>], iteration_bounds = array<i64: 4>, scalar_prefetch = 0 : i64, scratch_operands = 0 : i64, tpu.core_type = #tpu.core_type<tc>, window_params = [{transform_indices = @transform_0, window_bounds = array<i64: 64, 128>}, {transform_indices = @transform_1, window_bounds = array<i64: 64, 128>}, {transform_indices = @transform_2, window_bounds = array<i64: 1, 8, 128>}]} {
    %c0 = arith.constant 0 : index
    %c0_0 = arith.constant 0 : index
    %0 = vector.load %arg1[%c0, %c0_0] : memref<64x128xf32, #tpu.memory_space<vmem>>, vector<64x128xf32>
    %c0_1 = arith.constant 0 : index
    %c0_2 = arith.constant 0 : index
    %1 = vector.load %arg2[%c0_1, %c0_2] : memref<64x128xf32, #tpu.memory_space<vmem>>, vector<64x128xf32>
    %2 = arith.subf %0, %1 : vector<64x128xf32>
    %3 = math.absf %2 : vector<64x128xf32>
    %4 = vector.shape_cast %3 : vector<64x128xf32> to vector<8x8x128xf32>
    %cst = arith.constant dense<0.000000e+00> : vector<8x128xf32>
    %5 = vector.multi_reduction <add>, %4, %cst [0] : vector<8x8x128xf32> to vector<8x128xf32>
    %6 = vector.shape_cast %5 : vector<8x128xf32> to vector<1x8x128xf32>
    %c0_3 = arith.constant 0 : index
    %c0_4 = arith.constant 0 : index
    %c0_5 = arith.constant 0 : index
    %7 = vector.load %arg3[%c0_3, %c0_4, %c0_5] : memref<1x8x128xf32, #tpu.memory_space<vmem>>, vector<1x8x128xf32>
    tpu.vector_store %arg3[%c0_3, %c0_4, %c0_5], %6 {strides = array<i32>} : memref<1x8x128xf32, #tpu.memory_space<vmem>>, vector<1x8x128xf32>,
    return
  }
  func.func @transform_0(%arg0: i32) -> (i32, i32) {
    %c0_i32 = arith.constant 0 : i32
    %c0_i32_0 = arith.constant 0 : i32
    return %arg0, %c0_i32 : i32, i32
  }
  func.func @transform_1(%arg0: i32) -> (i32, i32) {
    %c0_i32 = arith.constant 0 : i32
    %c0_i32_0 = arith.constant 0 : i32
    return %arg0, %c0_i32 : i32, i32
  }
  func.func @transform_2(%arg0: i32) -> (i32, i32, i32) {
    %c0_i32 = arith.constant 0 : i32
    %c0_i32_0 = arith.constant 0 : i32
    %c0_i32_1 = arith.constant 0 : i32
    return %arg0, %c0_i32, %c0_i32_0 : i32, i32, i32
  }
}

</mosaic_0001>

<bundles_post_ra>
// kernel: tpu_custom_call.1
= control target key start
LH: loop header
LB: loop body
LE: loop exit
PB: predicated region body
PF: predicated region fallthrough
CT: control target
= control target key end

     0   :  { %7 = vsyncpa [#allocation3], 0  ;;  %s805_s0 = inlined_call_operand.hbm [shape: f32[256,128], index: 0, kind: input, shape index: {}]   ;;  %s806_s1 = inlined_call_operand.hbm [shape: f32[256,128], index: 1, kind: input, shape index: {}]   ;;  %s807_s2 = inlined_call_operand.hbm [shape: f32[4,8,128], index: 2, kind: output, shape index: {}]  }
   0x1   :  { %9 = vsyncpa [#allocation3 + $0x1], 0 }
   0x2   :  { %10 = vsyncpa [#allocation6], 0 }
   0x3   :  { %12 = vsyncpa [#allocation6 + $0x1], 0 }
   0x4   :  { %13 = vsyncpa [#allocation4], 0 }
   0x5   :  { %15 = vsyncpa [#allocation4 + $0x1], 0  ;;  %s575_s9 = smov 0   ;;  %s577_s10 = smov 0  }
   0x6   :  { %s579_s11 = smov 0   ;;  %s581_s12 = smov 0  }
   0x7 LB: > { %s596_s13 = sadd.s32 4294967295, %s553_s12   ;;  %s351_s14 = sadd.s32 4294967294, %s553_s12   ;;  %s553_s12 = sphi %s581_s12, %s822_s12   ;;  %s549_s11 = sphi %s579_s11, %s821_s11   ;;  %s545_s10 = sphi %s577_s10, %s820_s10   ;;  %s541_s9 = sphi %s575_s9, %s819_s9  }
   0x8   : > { %s600_s15 = sadd.s32 1, %s553_s12   ;;  %s28_s16 = sadd.s32 1, %s549_s11 }
   0x9   : > { %s25_s17 = ssub.s32 %s553_s12, %s600_s15  ;;  %p35_p0 = scmp.ne.s32.totalorder %s549_s11, %s545_s10 }
   0xa   : > { %p26_p1 = scmp.eq.s32.totalorder %s25_s17, 0  ;;  %p36_p2 = scmp.eq.s32.totalorder %s553_s12, 0 }
   0xb   : > { %p41_p3 = scmp.ne.s32.totalorder %s545_s10, %s541_s9  ;;  %p42_p4 = scmp.eq.s32.totalorder %s596_s13, 0 }
   0xc   : > { %s612_s18 = scalar_select %p26_p1, %s549_s11, %s28_s16  }
   0xd   : > { %p614_p5 = por %p36_p2, %p35_p0  ;;  %p618_p6 = por %p42_p4, %p41_p3 }
   0xe   : > { %p91_p7 = scmp.eq.s32.totalorder %s596_s13, 3  ;;  %p97_p8 = scmp.eq.s32.totalorder %s351_s14, 3 }
   0xf   : > { %s811_s20 = scalar_select %p618_p6, 1, 0 }
  0x10   : > { %p387_p9 = scmp.lt.s32.totalorder %s553_s12, 4  ;;  %p624_p10 = por %p91_p7, %p35_p0 }
  0x11   : > { %p628_p11 = por %p97_p8, %p41_p3  ;;  %s633_s23 = sand.u32 1, %s549_s11  }
  0x12   : > { %s812_s21 = scalar_select %p624_p10, 1, 0 }
  0x13   : > { %s813_s22 = scalar_select %p628_p11, 1, 0 }
  0x14   : > { %s368_s24 = sshll.u32 %s553_s12, 10  ;;  %s354_s25 = sshll.u32 %s633_s23, 6 }
  0x15   : > { %s642_s28 = scalar_lea.hbm %s805_s0, %s368_s24  ;;  %s121_s29 = scalar_lea.vmem [#allocation2], %s354_s25 }
  0x16   : > { %s128_s30 = sshll.u32 %s121_s29, 4  ;;  %p648_p12 = pnand %p387_p9, %p614_p5  ;;  %s652_s30 = int_to_ptr.vmem [resolvable:$true] %s128_s30 }
  0x17   : > { %s118_s4 = scalar_lea.sflag [#allocation3], %s633_s23  ;;  %s423_s5 = scalar_lea.hbm %s642_s28, 1024 }
  0x18   : > { %p424_p13 = scmp.ne.s32.totalorder %s642_s28, %s423_s5  ;;  %p425_p0 = pneg %p648_p12 }
  0x19   : > { %s428_s8 = scalar_lea.hbm %s805_s0, 4096  ;;  %p429_p3 = scmp.lt.u32.totalorder %s642_s28, %s805_s0 }
  0x1a   : > { %p426_p1 = pnand %p425_p0, %p424_p13  ;;  %p430_p4 = scmp.lt.u32.totalorder %s428_s8, %s423_s5 }
  0x1b   : > { %p432_p7 = scmp.lt.u32.totalorder %s423_s5, %s642_s28 }
  0x1c   : > { %p427_p2 = pneg %p426_p1  ;;  %p431_p5 = por %p430_p4, %p429_p3 }
  0x1e   : > { %p433_p8 = por %p432_p7, %p431_p5 }
  0x20   : > { %p434_p9 = pnand %p433_p8, %p427_p2 }
  0x22   : > { %437 = shalt.err (!%p434_p9)
}
  0x23   : > { %s438_s17 = scalar_lea.vmem %s652_s30, 1024  ;;  %s555_s19 = smov [#allocation2]  }
  0x24   : > { %p439_p13 = scmp.ne.s32.totalorder %s652_s30, %s438_s17  ;;  %s443_s26 = sshll.u32 %s555_s19, 4  ;;  %s444_s26 = int_to_ptr.vmem [resolvable:$false] %s443_s26 }
  0x25   : > { %s445_s27 = scalar_lea.vmem %s444_s26, 2048  ;;  %p446_p10 = scmp.lt.s32.totalorder %s652_s30, %s444_s26 }
  0x26   : > { %p441_p1 = pnand %p439_p13, %p425_p0  ;;  %p447_p3 = scmp.lt.s32.totalorder %s445_s27, %s438_s17 }
  0x28   : > { %p442_p11 = pneg %p441_p1  ;;  %p448_p4 = por %p447_p3, %p446_p10 }
  0x2a   : > { %p449_p5 = pnand %p448_p4, %p442_p11 }
  0x2c   : > { %452 = shalt.err (!%p449_p5)
}
  0x2d   : > { %s556_s29 = smov 128   ;;  %s557_s5 = smov 8  }
  0x2e   : > { %379 = dma.hbm_to_vmem [thread:$0]  (!%p648_p12), %s642_s28, 1024, %s652_s30, %s118_s4, %s556_s29, %s556_s29, %s557_s5  }
  0x2f   : > { %p360_p10 = scmp.ge.s32.totalorder %s553_s12, 1  ;;  %p157_p11 = scmp.lt.s32.totalorder %s553_s12, 5 }
  0x30   : > { %s696_s14 = scalar_lea.hbm %s806_s1, %s368_s24  ;;  %s142_s16 = scalar_lea.vmem [#allocation5], %s354_s25 }
  0x31   : > { %p687_p2 = pnand %p360_p10, %p157_p11  ;;  %s149_s17 = sshll.u32 %s142_s16, 4  ;;  %s700_s17 = int_to_ptr.vmem [resolvable:$true] %s149_s17 }
  0x32   : > { %s139_s28 = scalar_lea.sflag [#allocation6], %s633_s23  ;;  %s453_s30 = scalar_lea.hbm %s696_s14, 1024 }
  0x33   : > { %p454_p7 = scmp.ne.s32.totalorder %s696_s14, %s453_s30  ;;  %s458_s24 = scalar_lea.hbm %s806_s1, 4096 }
  0x34   : > { %p459_p13 = scmp.lt.u32.totalorder %s696_s14, %s806_s1  ;;  %p460_p1 = scmp.lt.u32.totalorder %s458_s24, %s453_s30 }
  0x35   : > { %p456_p8 = pnand %p454_p7, %p425_p0  ;;  %p462_p4 = scmp.lt.u32.totalorder %s453_s30, %s696_s14 }
  0x36   : > { %p461_p3 = por %p460_p1, %p459_p13 }
  0x37   : > { %p457_p9 = pneg %p456_p8 }
  0x38   : > { %p463_p5 = por %p462_p4, %p461_p3 }
  0x3a   : > { %p464_p10 = pnand %p463_p5, %p457_p9 }
  0x3c   : > { %467 = shalt.err (!%p464_p10)
}
  0x3d   : > { %s468_s25 = scalar_lea.vmem %s700_s17, 1024  ;;  %s558_s7 = smov [#allocation5]  }
  0x3e   : > { %p469_p11 = scmp.ne.s32.totalorder %s700_s17, %s468_s25  ;;  %s473_s8 = sshll.u32 %s558_s7, 4  ;;  %s474_s8 = int_to_ptr.vmem [resolvable:$false] %s473_s8 }
  0x3f   : > { %s475_s16 = scalar_lea.vmem %s474_s8, 2048  ;;  %p476_p6 = scmp.lt.s32.totalorder %s700_s17, %s474_s8 }
  0x40   : > { %p471_p7 = pnand %p469_p11, %p425_p0  ;;  %p477_p13 = scmp.lt.s32.totalorder %s475_s16, %s468_s25 }
  0x42   : > { %p472_p8 = pneg %p471_p7  ;;  %p478_p1 = por %p477_p13, %p476_p6 }
  0x44   : > { %p479_p3 = pnand %p478_p1, %p472_p8 }
  0x46   : > { %482 = shalt.err (!%p479_p3)
}
  0x47   : > { %382 = dma.hbm_to_vmem [thread:$0]  (!%p648_p12), %s696_s14, 1024, %s700_s17, %s139_s28, %s556_s29, %s556_s29, %s557_s5  }
  0x48   : > { %161 = sbr.rel (%p687_p2) target bundleno = 117 (0x75), region = 28  ;;  %s734_s30 = sand.u32 (!%p687_p2), 1, %s545_s10  }
  0x49   : > { %s361_s4 = sshll.u32 (!%p687_p2), %s734_s30, 6  ;;  %s164_s19 = scalar_lea.sflag (!%p687_p2), [#allocation3], %s734_s30 }
  0x4a   : > { %s738_s3 = scalar_lea.vmem (!%p687_p2), [#allocation2], %s361_s4  ;;  %p816_p6 = scmp.ne.s32.totalorder (!%p687_p2), %s811_s20, 0 }
  0x4f   : > { %528 = dma.done.wait (%p816_p6), %s164_s19, 1024  }
  0x50   : > { %530 = vsyncadd (%p816_p6), %s164_s19, 4294966272  ;;  %s173_s23 = scalar_lea.sflag [#allocation6], %s734_s30  ;;  %s176_s29 = scalar_lea.vmem [#allocation5], %s361_s4 }
  0x51   : > { %532 = dma.done.wait (%p816_p6), %s173_s23, 1024  }
  0x52   : > { %534 = vsyncadd (%p816_p6), %s173_s23, 4294966272  ;;  %v204_v0 = vld [vmem:[%s738_s3] sm:$0xff]  ;;  %v205_v1 = vld [vmem:[%s738_s3 + $0x8] sm:$0xff]  ;;  %s363_s20 = sshll.u32 %s734_s30, 3  ;;  %s365_s14 = sshll.u32 %s596_s13, 7 }
  0x53   : > { %v206_v2 = vld [vmem:[%s738_s3 + $0x10] sm:$0xff]  ;;  %v207_v3 = vld [vmem:[%s738_s3 + $0x18] sm:$0xff]  ;;  %v208_v4 = vld [vmem:[%s738_s3 + $0x20] sm:$0xff]  ;;  %s201_s5 = scalar_lea.vmem [#allocation7], %s363_s20  ;;  %s764_s24 = scalar_lea.hbm %s807_s2, %s365_s14 }
  0x54   : > { %v212_v5 = vld [vmem:[%s176_s29] sm:$0xff]  ;;  %v213_v6 = vld [vmem:[%s176_s29 + $0x8] sm:$0xff]  ;;  %v214_v7 = vld [vmem:[%s176_s29 + $0x10] sm:$0xff]  ;;  %s258_s6 = sshll.u32 %s201_s5, 4  ;;  %s245_s26 = scalar_lea.sflag [#allocation4], %s734_s30  ;;  %s759_s6 = int_to_ptr.vmem [resolvable:$true] %s258_s6 }
  0x55   : > { %v215_v8 = vld [vmem:[%s176_s29 + $0x18] sm:$0xff]  ;;  %v220_v9 = vsub.f32 %v204_v0, %v212_v5  ;;  %v216_v10 = vld [vmem:[%s176_s29 + $0x20] sm:$0xff]  ;;  %v221_v11 = vsub.f32 %v205_v1, %v213_v6  ;;  %v222_v12 = vsub.f32 %v206_v2, %v214_v7  ;;  %v209_v14 = vld [vmem:[%s738_s3 + $0x28] sm:$0xff]  ;;  %s483_s27 = scalar_lea.vmem %s759_s6, 128  ;;  %p817_p0 = scmp.ne.s32.totalorder %s812_s21, 0 }
  0x56   : > { %v223_v13 = vsub.f32 %v207_v3, %v215_v8  ;;  %v217_v15 = vld [vmem:[%s176_s29 + $0x28] sm:$0xff]  ;;  %v224_v17 = vsub.f32 %v208_v4, %v216_v10  ;;  %v210_v20 = vld [vmem:[%s738_s3 + $0x30] sm:$0xff]  ;;  %v211_v25 = vld [vmem:[%s738_s3 + $0x38] sm:$0xff]  ;;  %p484_p12 = scmp.ne.s32.totalorder %s759_s6, %s483_s27  ;;  %s559_s13 = smov [#allocation7]  }
  0x57   : > { %v228_v16 = vand.u32 2147483647, %v220_v9  ;;  %v229_v18 = vand.u32 2147483647, %v221_v11  ;;  %v230_v19 = vand.u32 2147483647, %v222_v12  ;;  %v225_v22 = vsub.f32 %v209_v14, %v217_v15 }
  0x58   : > { %v218_v21 = vld [vmem:[%s176_s29 + $0x30] sm:$0xff]  ;;  %v231_v23 = vand.u32 2147483647, %v223_v13  ;;  %v219_v26 = vld [vmem:[%s176_s29 + $0x38] sm:$0xff]  ;;  %v232_v28 = vand.u32 2147483647, %v224_v17  ;;  %p485_p2 = pnand %p484_p12, %p817_p0 }
  0x59   : > { %v236_v24 = vadd.f32 %v229_v18, %v228_v16  ;;  %v226_v27 = vsub.f32 %v210_v20, %v218_v21  ;;  %v227_v30 = vsub.f32 %v211_v25, %v219_v26  ;;  %v233_v31 = vand.u32 2147483647, %v225_v22  ;;  %s487_s25 = sshll.u32 %s559_s13, 4  ;;  %s488_s25 = int_to_ptr.vmem [resolvable:$false] %s487_s25 }
  0x5a   : > { %p486_p9 = pneg %p485_p2  ;;  %s489_s7 = scalar_lea.vmem %s488_s25, 256 }
  0x5b   : > { %v237_v29 = vadd.f32 %v236_v24, %v230_v19  ;;  %v234_v33 = vand.u32 2147483647, %v226_v27  ;;  %v235_v35 = vand.u32 2147483647, %v227_v30  ;;  %p490_p4 = scmp.lt.s32.totalorder %s759_s6, %s488_s25  ;;  %p491_p5 = scmp.lt.s32.totalorder %s489_s7, %s483_s27 }
  0x5d   : > { %v238_v32 = vadd.f32 %v237_v29, %v231_v23  ;;  %p492_p10 = por %p491_p5, %p490_p4 }
  0x5f   : > { %v239_v34 = vadd.f32 %v238_v32, %v232_v28  ;;  %p493_p11 = pnand %p492_p10, %p486_p9 }
  0x61   : > { %v240_v36 = vadd.f32 %v239_v34, %v233_v31 }
  0x63   : > { %v241_v37 = vadd.f32 %v240_v36, %v234_v33 }
  0x65   : > { %v242_v38 = vadd.f32 %v241_v37, %v235_v35 }
  0x67   : > { %243 = vst [vmem:[%s201_s5] sm:$0xff] %v242_v38 }
  0x68   : > { %496 = shalt.err (!%p493_p11)
}
  0x69   : > { %s497_s8 = scalar_lea.hbm %s764_s24, 128  ;;  %s501_s4 = scalar_lea.hbm %s807_s2, 512 }
  0x6a   : > { %p498_p7 = scmp.ne.s32.totalorder %s764_s24, %s497_s8  ;;  %p502_p1 = scmp.lt.u32.totalorder %s764_s24, %s807_s2 }
  0x6b   : > { %p503_p3 = scmp.lt.u32.totalorder %s501_s4, %s497_s8  ;;  %p505_p12 = scmp.lt.u32.totalorder %s497_s8, %s764_s24 }
  0x6c   : > { %p499_p8 = pnand %p498_p7, %p817_p0 }
  0x6d   : > { %p504_p6 = por %p503_p3, %p502_p1 }
  0x6e   : > { %p500_p13 = pneg %p499_p8 }
  0x6f   : > { %p506_p2 = por %p505_p12, %p504_p6 }
  0x71   : > { %p507_p9 = pnand %p506_p2, %p500_p13 }
  0x73   : > { %510 = shalt.err (!%p507_p9)
}
  0x74   : > { %374 = dma.vmem_to_hbm [thread:$0]  (%p817_p0), %s759_s6, 128, %s764_s24, %s245_s26  }
  0x75 PF: > { %p388_p4 = scmp.ge.s32.totalorder %s553_s12, 2  ;;  %s270_s23 = sand.u32 1, %s541_s9  }
  0x76   : > { %p818_p5 = scmp.ne.s32.totalorder %s813_s22, 0  ;;  %s271_s29 = scalar_lea.sflag [#allocation4], %s270_s23 }
  0x78   : > { %p384_p10 = pnand %p388_p4, %p818_p5 }
  0x7a   : > { %536 = dma.done.wait (!%p384_p10), %s271_s29, 128  }
  0x7b   : > { %538 = vsyncadd (!%p384_p10), %s271_s29, 4294967168  ;;  %p18_p11 = scmp.ge.s32.totalorder %s600_s15, 6   ;;  %s819_s9 = smov %s545_s10 }
  0x7c   : > { %s820_s10 = smov %s549_s11  ;;  %s821_s11 = smov %s612_s18 }
  0x7d   : > { %s822_s12 = smov %s600_s15  ;;  %20 = sbr.rel (!%p18_p11) target bundleno = 7 (0x7), region = 86 }
  0x84   :  { %276 = vsyncpa [#allocation3], 1 }
  0x85   :  { %278 = vsyncpa [#allocation3 + $0x1], 1 }
  0x86   :  { %279 = vsyncpa [#allocation6], 1 }
  0x87   :  { %281 = vsyncpa [#allocation6 + $0x1], 1 }
  0x88   :  { %282 = vsyncpa [#allocation4], 1 }
  0x89   :  { %284 = vsyncpa [#allocation4 + $0x1], 1 }

</bundles_post_ra>
